<compile_context>
chip_gen: v7x
topology: tpu7x:2x2x1
jax: 0.10.0
libtpu: 0.0.40
codegen_flags: <defaults>
</compile_context>

<pallas_src>
import functools

import numpy as np
import jax
import jax.numpy as jnp
from jax.experimental import pallas as pl
from jax.experimental.pallas import tpu as pltpu

QUANTILE_COEFS = (-3.0, -0.834, -0.248, 0.248, 0.834)


def _round_up(v, m):
    return (v + m - 1) // m * m


def ehh_kernel(x_ref, scale_ref, shift_ref, rhs_ref, wmin_ref, bias_ref,
               out_ref, maxx_ref, minx_ref, *, q, pad_w, opad, mpad):
    # x_ref: (TB, N).  scale/shift already fold gamma, beta, mean, var.
    xs = x_ref[...] * scale_ref[...]                          # (TB, N)
    parts = [xs] * q                                          # level-major tiling
    if pad_w:
        parts.append(jnp.zeros((xs.shape[0], pad_w), xs.dtype))
    xrep = jnp.concatenate(parts, axis=1)                     # (TB, QNPAD)
    o = jnp.maximum(xrep + shift_ref[...], 0.0)               # all Q maxout levels at once
    maxx_ref[...] = o                                         # single lane-dense store

    # One fused K=QNPAD contraction: RHS = [w_max | S1 | S2] (128-padded cols).
    res = jnp.dot(o, rhs_ref[...], preferred_element_type=jnp.float32)
    acc = res[:, :opad]                                       # (TB, OPAD)  max-part of output
    g1 = res[:, opad:opad + mpad]                             # (TB, MPAD)  gathered feature 1
    g2 = res[:, opad + mpad:]                                 # (TB, MPAD)  gathered feature 2

    minx = jnp.minimum(g1, g2)
    minx_ref[...] = minx
    out_ref[...] = acc + jnp.dot(minx, wmin_ref[...],
                                 preferred_element_type=jnp.float32) + bias_ref[0]


def prepare_ehh_params(w, bias, chosen_idx, input_size, quantile,
                       intermediate_node, output_size):
    """One-time host-side weight prep (hoisted out of the per-call path)."""
    N, Q, M, O = input_size, quantile, intermediate_node, output_size
    QN = N * Q
    QNPAD = _round_up(QN, 128)
    OPAD = _round_up(max(O, 1), 128)
    MPAD = _round_up(max(M, 1), 128)

    w_np = np.asarray(w, np.float32)
    # PyTorch flattens max_x (B, N, Q) row-major -> w row n*Q + q; reorder those
    # rows to the kernel's level-major q*N + n layout.
    w_max = w_np[:QN].reshape(N, Q, O).transpose(1, 0, 2).reshape(QN, O)
    w_min = w_np[QN:]

    cidx = np.asarray(chosen_idx)
    col1 = cidx[:, 1] * N + cidx[:, 0]          # flat index of (n1, q1)
    col2 = cidx[:, 3] * N + cidx[:, 2]          # flat index of (n2, q2)

    rhs = np.zeros((QNPAD, OPAD + 2 * MPAD), np.float32)
    rhs[:QN, :O] = w_max
    rhs[col1, OPAD + np.arange(M)] = 1.0        # one-hot gather columns (pair 1)
    rhs[col2, OPAD + MPAD + np.arange(M)] = 1.0  # one-hot gather columns (pair 2)

    wmin_pad = np.zeros((MPAD, OPAD), np.float32)
    wmin_pad[:M, :O] = w_min

    return dict(
        rhs=jnp.asarray(rhs),
        wmin=jnp.asarray(wmin_pad),
        bias=jnp.asarray(bias, jnp.float32).reshape(1),
        N=N, Q=Q, M=M, O=O, QN=QN, QNPAD=QNPAD, OPAD=OPAD, MPAD=MPAD,
    )


def ehh_forward(x, gamma, beta, params, tb=128):
    """Returns (output, max_x (B,N,Q), min_x). jit-compatible."""
    N, Q, M, O = params["N"], params["Q"], params["M"], params["O"]
    QN, QNPAD = params["QN"], params["QNPAD"]
    OPAD, MPAD = params["OPAD"], params["MPAD"]

    x = x.astype(jnp.float32)
    gamma = gamma.astype(jnp.float32)
    beta = beta.astype(jnp.float32)
    B = x.shape[0]

    # Batch-norm stats are a full-batch reduction -> computed here, then folded
    # into per-level scale/shift rows so the kernel does only broadcast+relu.
    mean = jnp.mean(x, axis=0)                                # (N,)
    var = jnp.mean((x - mean) ** 2, axis=0)                   # biased variance
    scale = gamma * jax.lax.rsqrt(var + 0.001)                # (N,)
    base = beta - mean * scale                                # normed = x*scale + base
    shifts = [base]
    for c in QUANTILE_COEFS:
        shifts.append(base - (c * var + mean) * gamma + beta)
    shift_flat = jnp.concatenate(shifts)                      # (QN,) level-major (q*N + n)
    shift_flat = jnp.pad(shift_flat, (0, QNPAD - QN)).reshape(1, QNPAD)

    # Batch tiling (parallel grid -> pipelines + shards across TensorCores).
    TB = min(tb, _round_up(B, 8))
    B_pad = _round_up(B, TB)
    if B_pad != B:
        x = jnp.pad(x, ((0, B_pad - B), (0, 0)))

    kern = functools.partial(ehh_kernel, q=Q, pad_w=QNPAD - QN,
                             opad=OPAD, mpad=MPAD)
    out_pad, maxx_flat, minx_pad = pl.pallas_call(
        kern,
        out_shape=(
            jax.ShapeDtypeStruct((B_pad, OPAD), jnp.float32),
            jax.ShapeDtypeStruct((B_pad, QNPAD), jnp.float32),
            jax.ShapeDtypeStruct((B_pad, MPAD), jnp.float32),
        ),
        grid=(B_pad // TB,),
        in_specs=[
            pl.BlockSpec((TB, N), lambda i: (i, 0)),
            pl.BlockSpec((1, N), lambda i: (0, 0)),
            pl.BlockSpec((1, QNPAD), lambda i: (0, 0)),
            pl.BlockSpec((QNPAD, OPAD + 2 * MPAD), lambda i: (0, 0)),
            pl.BlockSpec((MPAD, OPAD), lambda i: (0, 0)),
            pl.BlockSpec(memory_space=pltpu.MemorySpace.SMEM),
        ],
        out_specs=(
            pl.BlockSpec((TB, OPAD), lambda i: (i, 0)),
            pl.BlockSpec((TB, QNPAD), lambda i: (i, 0)),
            pl.BlockSpec((TB, MPAD), lambda i: (i, 0)),
        ),
        compiler_params=pltpu.CompilerParams(
            dimension_semantics=("parallel",),
            vmem_limit_bytes=32 * 1024 * 1024,   # safe on v5e/v6e/v7x at these shapes
        ),
    )(x, scale.reshape(1, N), shift_flat, params["rhs"], params["wmin"],
      params["bias"])

    out = out_pad[:B, :O]
    min_x = minx_pad[:B, :M]
    # Kernel-native layout is level-major (B, Q, N); transpose once (outside the
    # kernel) to the PyTorch (B, N, Q) layout.
    max_x = jnp.transpose(maxx_flat[:B, :QN].reshape(B, Q, N), (0, 2, 1))
    return out, max_x, min_x


def ehh_reference(x, gamma, beta, w, bias, chosen_idx):
    """Pure-JAX reference mirroring the PyTorch forward."""
    B, N = x.shape
    mean = jnp.mean(x, axis=0)
    var = jnp.mean((x - mean) ** 2, axis=0)
    normed = gamma * (x - mean) / jnp.sqrt(var + 0.001) + beta
    outs = [jnp.maximum(normed, 0.0)]
    for c in QUANTILE_COEFS:
        quant = c * var + mean
        outs.append(jnp.maximum(normed - quant * gamma + beta, 0.0))
    max_x = jnp.transpose(jnp.stack(outs, 0), (1, 2, 0))      # (B, N, Q)
    d1 = max_x[:, chosen_idx[:, 0], chosen_idx[:, 1]]
    d2 = max_x[:, chosen_idx[:, 2], chosen_idx[:, 3]]
    min_x = jnp.minimum(d1, d2)
    feat = jnp.concatenate([max_x.reshape(B, -1), min_x], axis=1)
    out = jnp.dot(feat, w, precision=jax.lax.Precision.HIGHEST) + bias[0]
    return out, max_x, min_x


if __name__ == "__main__":
    B, N, Q, M, O = 8, 16, 6, 32, 4     # batch, input_size, quantile, intermediate, output
    key = jax.random.PRNGKey(0)
    kx, kw, kb, k1, k2, k3, k4 = jax.random.split(key, 7)

    x = jax.random.normal(kx, (B, N), jnp.float32)
    gamma = jnp.ones((N,), jnp.float32)        # Batch_Norm_Layer init
    beta = jnp.zeros((N,), jnp.float32)
    w = jax.random.normal(kw, (M + N * Q, O), jnp.float32)    # Parameter(randn(...))
    bias = jax.random.normal(kb, (1,), jnp.float32)           # Parameter(randn(1))

    # Deterministic chosen (n1, q1, n2, q2) pairs, n1 != n2 (stands in for the
    # random epsilon-search / CSV structure selection).
    n1 = jax.random.randint(k1, (M,), 0, N)
    n2 = jax.random.randint(k2, (M,), 0, N)
    n2 = jnp.where(n2 == n1, (n2 + 1) % N, n2)
    q1 = jax.random.randint(k3, (M,), 0, Q)
    q2 = jax.random.randint(k4, (M,), 0, Q)
    chosen_idx = np.stack(
        [np.asarray(n1), np.asarray(q1), np.asarray(n2), np.asarray(q2)], axis=1)

    # One-time weight/index prep (hoisted out of the per-call path).
    params = prepare_ehh_params(w, bias, chosen_idx, input_size=N, quantile=Q,
                                intermediate_node=M, output_size=O)

    fwd = jax.jit(functools.partial(ehh_forward, params=params))
    out, max_x, min_x = fwd(x, gamma, beta)
    jax.block_until_ready(out)

    ref_out, ref_max_x, ref_min_x = ehh_reference(x, gamma, beta, w, bias, chosen_idx)
    np.testing.assert_allclose(np.asarray(max_x), np.asarray(ref_max_x),
                               rtol=2e-3, atol=2e-3)
    np.testing.assert_allclose(np.asarray(min_x), np.asarray(ref_min_x),
                               rtol=2e-3, atol=2e-3)
    np.testing.assert_allclose(np.asarray(out), np.asarray(ref_out),
                               rtol=2e-3, atol=2e-3)

    print("KERNEL_OK")
</pallas_src>

<mosaic_0001>
module attributes {stable_mosaic.version = 11 : i64} {
  func.func @ehh_kernel(%arg0: i32, %arg1: memref<8x16xf32, #tpu.memory_space<vmem>>, %arg2: memref<1x16xf32, #tpu.memory_space<vmem>>, %arg3: memref<1x128xf32, #tpu.memory_space<vmem>>, %arg4: memref<128x384xf32, #tpu.memory_space<vmem>>, %arg5: memref<128x128xf32, #tpu.memory_space<vmem>>, %arg6: memref<1xf32, #tpu.memory_space<smem>>, %arg7: memref<8x128xf32, #tpu.memory_space<vmem>>, %arg8: memref<8x128xf32, #tpu.memory_space<vmem>>, %arg9: memref<8x128xf32, #tpu.memory_space<vmem>>) attributes {dimension_semantics = [#tpu.dimension_semantics<parallel>], iteration_bounds = array<i64: 1>, scalar_prefetch = 0 : i64, scratch_operands = 0 : i64, tpu.core_type = #tpu.core_type<tc>, window_params = [{transform_indices = @transform_0, window_bounds = array<i64: 8, 16>}, {pipeline_mode = #tpu.pipeline_mode<synchronous>, transform_indices = @transform_1, window_bounds = array<i64: 1, 16>}, {pipeline_mode = #tpu.pipeline_mode<synchronous>, transform_indices = @transform_2, window_bounds = array<i64: 1, 128>}, {pipeline_mode = #tpu.pipeline_mode<synchronous>, transform_indices = @transform_3, window_bounds = array<i64: 128, 384>}, {pipeline_mode = #tpu.pipeline_mode<synchronous>, transform_indices = @transform_4, window_bounds = array<i64: 128, 128>}, {transform_indices = @transform_5, window_bounds = array<i64: 1>}, {transform_indices = @transform_6, window_bounds = array<i64: 8, 128>}, {transform_indices = @transform_7, window_bounds = array<i64: 8, 128>}, {transform_indices = @transform_8, window_bounds = array<i64: 8, 128>}]} {
    %c0 = arith.constant 0 : index
    %c0_0 = arith.constant 0 : index
    %0 = vector.load %arg1[%c0, %c0_0] : memref<8x16xf32, #tpu.memory_space<vmem>>, vector<8x16xf32>
    %c0_1 = arith.constant 0 : index
    %c0_2 = arith.constant 0 : index
    %1 = vector.load %arg2[%c0_1, %c0_2] : memref<1x16xf32, #tpu.memory_space<vmem>>, vector<1x16xf32>
    %2 = vector.broadcast %1 : vector<1x16xf32> to vector<8x16xf32>
    %3 = arith.mulf %0, %2 : vector<8x16xf32>
    %cst = arith.constant 0.000000e+00 : f32
    %4 = vector.broadcast %cst : f32 to vector<8x32xf32>
    %5 = tpu.concatenate %3, %3, %3, %3, %3, %3, %4 in 1 : vector<8x16xf32>, vector<8x16xf32>, vector<8x16xf32>, vector<8x16xf32>, vector<8x16xf32>, vector<8x16xf32>, vector<8x32xf32> -> vector<8x128xf32>
    %c0_3 = arith.constant 0 : index
    %c0_4 = arith.constant 0 : index
    %6 = vector.load %arg3[%c0_3, %c0_4] : memref<1x128xf32, #tpu.memory_space<vmem>>, vector<1x128xf32>
    %7 = vector.broadcast %6 : vector<1x128xf32> to vector<8x128xf32>
    %8 = arith.addf %5, %7 : vector<8x128xf32>
    %cst_5 = arith.constant 0.000000e+00 : f32
    %9 = vector.broadcast %cst_5 : f32 to vector<8x128xf32>
    %10 = arith.maximumf %8, %9 : vector<8x128xf32>
    %c0_6 = arith.constant 0 : index
    %c0_7 = arith.constant 0 : index
    %11 = vector.load %arg8[%c0_6, %c0_7] : memref<8x128xf32, #tpu.memory_space<vmem>>, vector<8x128xf32>
    tpu.vector_store %arg8[%c0_6, %c0_7], %10 {strides = array<i32>} : memref<8x128xf32, #tpu.memory_space<vmem>>, vector<8x128xf32>,
    %c0_8 = arith.constant 0 : index
    %c0_9 = arith.constant 0 : index
    %12 = vector.load %arg4[%c0_8, %c0_9] : memref<128x384xf32, #tpu.memory_space<vmem>>, vector<128x384xf32>
    %cst_10 = arith.constant dense<0.000000e+00> : vector<8x384xf32>
    %13 = tpu.matmul %10, %12, %cst_10 {dimension_numbers = #tpu.dot_dimension_numbers<[1], [0], [0], [1], [0, 0, 1, 1], [], []>} : vector<8x128xf32>, vector<128x384xf32>, vector<8x384xf32> -> vector<8x384xf32>
    %14 = vector.extract_strided_slice %13 {offsets = [0, 0], sizes = [8, 128], strides = [1, 1]} : vector<8x384xf32> to vector<8x128xf32>
    %15 = vector.extract_strided_slice %13 {offsets = [0, 128], sizes = [8, 128], strides = [1, 1]} : vector<8x384xf32> to vector<8x128xf32>
    %16 = vector.extract_strided_slice %13 {offsets = [0, 256], sizes = [8, 128], strides = [1, 1]} : vector<8x384xf32> to vector<8x128xf32>
    %17 = arith.minimumf %15, %16 : vector<8x128xf32>
    %c0_11 = arith.constant 0 : index
    %c0_12 = arith.constant 0 : index
    %18 = vector.load %arg9[%c0_11, %c0_12] : memref<8x128xf32, #tpu.memory_space<vmem>>, vector<8x128xf32>
    tpu.vector_store %arg9[%c0_11, %c0_12], %17 {strides = array<i32>} : memref<8x128xf32, #tpu.memory_space<vmem>>, vector<8x128xf32>,
    %c0_13 = arith.constant 0 : index
    %c0_14 = arith.constant 0 : index
    %19 = vector.load %arg5[%c0_13, %c0_14] : memref<128x128xf32, #tpu.memory_space<vmem>>, vector<128x128xf32>
    %cst_15 = arith.constant dense<0.000000e+00> : vector<8x128xf32>
    %20 = tpu.matmul %17, %19, %cst_15 {dimension_numbers = #tpu.dot_dimension_numbers<[1], [0], [0], [1], [0, 0, 1, 1], [], []>} : vector<8x128xf32>, vector<128x128xf32>, vector<8x128xf32> -> vector<8x128xf32>
    %21 = arith.addf %14, %20 : vector<8x128xf32>
    %c0_16 = arith.constant 0 : index
    %22 = memref.load %arg6[%c0_16] : memref<1xf32, #tpu.memory_space<smem>>
    %23 = vector.broadcast %22 : f32 to vector<8x128xf32>
    %24 = arith.addf %21, %23 : vector<8x128xf32>
    %c0_17 = arith.constant 0 : index
    %c0_18 = arith.constant 0 : index
    %25 = vector.load %arg7[%c0_17, %c0_18] : memref<8x128xf32, #tpu.memory_space<vmem>>, vector<8x128xf32>
    tpu.vector_store %arg7[%c0_17, %c0_18], %24 {strides = array<i32>} : memref<8x128xf32, #tpu.memory_space<vmem>>, vector<8x128xf32>,
    return
  }
  func.func @transform_0(%arg0: i32) -> (i32, i32) {
    %c0_i32 = arith.constant 0 : i32
    %c0_i32_0 = arith.constant 0 : i32
    return %arg0, %c0_i32 : i32, i32
  }
  func.func @transform_1(%arg0: i32) -> (i32, i32) {
    %c0_i32 = arith.constant 0 : i32
    %c0_i32_0 = arith.constant 0 : i32
    %c0_i32_1 = arith.constant 0 : i32
    return %c0_i32, %c0_i32_0 : i32, i32
  }
  func.func @transform_2(%arg0: i32) -> (i32, i32) {
    %c0_i32 = arith.constant 0 : i32
    %c0_i32_0 = arith.constant 0 : i32
    %c0_i32_1 = arith.constant 0 : i32
    return %c0_i32, %c0_i32_0 : i32, i32
  }
  func.func @transform_3(%arg0: i32) -> (i32, i32) {
    %c0_i32 = arith.constant 0 : i32
    %c0_i32_0 = arith.constant 0 : i32
    %c0_i32_1 = arith.constant 0 : i32
    return %c0_i32, %c0_i32_0 : i32, i32
  }
  func.func @transform_4(%arg0: i32) -> (i32, i32) {
    %c0_i32 = arith.constant 0 : i32
    %c0_i32_0 = arith.constant 0 : i32
    %c0_i32_1 = arith.constant 0 : i32
    return %c0_i32, %c0_i32_0 : i32, i32
  }
  func.func @transform_5(%arg0: i32) -> i32 {
    %c0_i32 = arith.constant 0 : i32
    %c0_i32_0 = arith.constant 0 : i32
    return %c0_i32 : i32
  }
  func.func @transform_6(%arg0: i32) -> (i32, i32) {
    %c0_i32 = arith.constant 0 : i32
    %c0_i32_0 = arith.constant 0 : i32
    return %arg0, %c0_i32 : i32, i32
  }
  func.func @transform_7(%arg0: i32) -> (i32, i32) {
    %c0_i32 = arith.constant 0 : i32
    %c0_i32_0 = arith.constant 0 : i32
    return %arg0, %c0_i32 : i32, i32
  }
  func.func @transform_8(%arg0: i32) -> (i32, i32) {
    %c0_i32 = arith.constant 0 : i32
    %c0_i32_0 = arith.constant 0 : i32
    return %arg0, %c0_i32 : i32, i32
  }
}

</mosaic_0001>

<bundles_post_ra>
// kernel: ehh_forward.1
= control target key start
LH: loop header
LB: loop body
LE: loop exit
PB: predicated region body
PF: predicated region fallthrough
CT: control target
= control target key end

     0   :  { %15 = vsyncpa [#allocation4], 0  ;;  %s825_s0 = inlined_call_operand.vmem [shape: f32[8,16], index: 0, kind: input, shape index: {}]   ;;  %s826_s1 = inlined_call_operand.vmem [shape: f32[1,16], index: 1, kind: input, shape index: {}]   ;;  %s827_s2 = inlined_call_operand.vmem [shape: f32[1,128], index: 2, kind: input, shape index: {}]   ;;  %s828_s3 = inlined_call_operand.hbm [shape: f32[128,384], index: 3, kind: input, shape index: {}]   ;;  %s829_s4 = inlined_call_operand.hbm [shape: f32[128,128], index: 4, kind: input, shape index: {}]   ;;  %s830_s5 = inlined_call_operand.<no memory space> [shape: f32[1], index: 5, kind: input, shape index: {}]   ;;  %s831_s6 = inlined_call_operand.vmem [shape: f32[8,128], index: 6, kind: output, shape index: {0}]   ;;  %s832_s7 = inlined_call_operand.vmem [shape: f32[8,128], index: 7, kind: output, shape index: {1}]   ;;  %s833_s8 = inlined_call_operand.hbm [shape: f32[8,128], index: 8, kind: output, shape index: {2}]  }
   0x1   :  { %16 = vsyncpa [#allocation7], 0 }
   0x2   :  { %17 = vsyncpa [#allocation5], 0  ;;  %s682_s27 = smov [#allocation3]   ;;  %s610_s9 = scalar_lea.hbm %s828_s3, 6144 }
   0x3   :  { %s29_s28 = sshll.u32 %s682_s27, 4  ;;  %p611_p0 = scmp.ne.s32.totalorder %s828_s3, %s610_s9  ;;  %s30_s28 = int_to_ptr.vmem [resolvable:$true] %s29_s28 }
   0x4   :  { %p614_p1 = scmp.lt.u32.totalorder %s610_s9, %s828_s3 }
   0x6   :  { %p616_p2 = pnand %p614_p1, %p611_p0 }
   0x8   :  { %619 = shalt.err (!%p616_p2)
}
   0x9   :  { %s620_s14 = scalar_lea.vmem %s30_s28, 6144  ;;  %p625_p4 = scmp.lt.s32.totalorder %s30_s28, %s30_s28 }
   0xa   :  { %p621_p3 = scmp.ne.s32.totalorder %s30_s28, %s620_s14  ;;  %p626_p5 = scmp.lt.s32.totalorder %s620_s14, %s620_s14 }
   0xc   :  { %p627_p6 = por %p626_p5, %p625_p4 }
   0xe   :  { %p628_p7 = pnand %p627_p6, %p621_p3 }
  0x10   :  { %631 = shalt.err (!%p628_p7)
}
  0x11   :  { %s683_s15 = smov 384   ;;  %s684_s16 = smov 24  }
  0x12   :  { %35 = dma.hbm_to_vmem [thread:$0]  %s828_s3, 6144, %s30_s28, [#allocation4], %s683_s15, %s683_s15, %s684_s16  }
  0x13   :  { %s685_s19 = smov [#allocation6]   ;;  %s632_s23 = scalar_lea.hbm %s829_s4, 2048 }
  0x14   :  { %s41_s20 = sshll.u32 %s685_s19, 4  ;;  %p633_p8 = scmp.ne.s32.totalorder %s829_s4, %s632_s23  ;;  %s42_s20 = int_to_ptr.vmem [resolvable:$true] %s41_s20 }
  0x15   :  { %p636_p9 = scmp.lt.u32.totalorder %s632_s23, %s829_s4 }
  0x17   :  { %p638_p10 = pnand %p636_p9, %p633_p8 }
  0x19   :  { %641 = shalt.err (!%p638_p10)
}
  0x1a   :  { %s642_s29 = scalar_lea.vmem %s42_s20, 2048  ;;  %p647_p12 = scmp.lt.s32.totalorder %s42_s20, %s42_s20 }
  0x1b   :  { %p643_p11 = scmp.ne.s32.totalorder %s42_s20, %s642_s29  ;;  %p648_p13 = scmp.lt.s32.totalorder %s642_s29, %s642_s29 }
  0x1d   :  { %p649_p0 = por %p648_p13, %p647_p12 }
  0x1f   :  { %p650_p1 = pnand %p649_p0, %p643_p11 }
  0x21   :  { %653 = shalt.err (!%p650_p1)
}
  0x22   :  { %s686_s3 = smov 128   ;;  %s687_s28 = smov 8  }
  0x23   :  { %47 = dma.hbm_to_vmem [thread:$0]  %s829_s4, 2048, %s42_s20, [#allocation7], %s686_s3, %s686_s3, %s687_s28  }
  0x24   :  { %676 = dma.done.wait [#allocation4], 6144  }
  0x25   :  { %677 = vsyncadd [#allocation4], 4294961152 }
  0x26   :  { %678 = dma.done.wait [#allocation7], 2048  }
  0x27   :  { %679 = vsyncadd [#allocation7], 4294965248  ;;  %v688_v0 = vmov 0.0|0.0   ;;  %v56_v1 = vld [vmem:[%s825_s0] sm:$0xff]  ;;  %v104_v3 = vld [vmem:[#allocation3 + $0x8] sm:$0xff]  ;;  %v689_v8 = vmov 0.0  }
  0x28   :  { %547 = vmatprep.subr.bf16.mxu1 %v688_v0  ;;  %v409_v2 = vld [vmem:[%s826_s1] ss:$0 sm:$0xff]  ;;  %v106_v7 = vld [vmem:[#allocation3 + $0x18] sm:$0xff]  ;;  %215 = vmatprep.mubr.f32.mxu0 %v689_v8  ;;  %vm690_vm0 = vmmov 0   ;;  %v105_v11 = vld [vmem:[#allocation3 + $0x10] sm:$0xff]  ;;  %s691_s0 = smov 16  }
  0x29   :  { %v773_v4 = vmul.f32 %v409_v2, %v56_v1  ;;  %v107_v5 = vld [vmem:[#allocation3 + $0x20] sm:$0xff]  ;;  %477 = vmatprep.mubr.msk.f32.mxu1 %vm690_vm0, %v689_v8  ;;  %v108_v12 = vld [vmem:[#allocation3 + $0x28] sm:$0xff]  ;;  %v110_v13 = vld [vmem:[#allocation3 + $0x38] sm:$0xff]  ;;  %s692_s1 = smov 48   ;;  %s693_s4 = smov 32   ;;  %vm81_vm1 = vcmask 130048  }
  0x2a   :  { %v103_v6 = vld [vmem:[#allocation3] sm:$0xff]  ;;  %v515_v9 = vpack.c.bf16 %v107_v5, %v104_v3  ;;  %v548_v14 = vpack.c.bf16 %v108_v12, %v105_v11  ;;  %v113_v15 = vld [vmem:[#allocation3 + $0x50] sm:$0xff]  ;;  %v112_v17 = vld [vmem:[#allocation3 + $0x48] sm:$0xff]  ;;  %s694_s14 = smov 64   ;;  %s695_s15 = smov 80   ;;  %vm83_vm2 = vcmask 261120  }
  0x2b   :  { %v517_v10 = vpack.c.bf16 %v106_v7, %v103_v6  ;;  %66 = vrot.lane.b32.xlu0 %v773_v4, %s691_s0  ;;  %72 = vrot.lane.b32.xlu1 %v773_v4, %s692_s1  ;;  %v109_v16 = vld [vmem:[#allocation3 + $0x30] sm:$0xff]  ;;  %v519_v18 = vpack.c.bf16 %v113_v15, %v110_v13  ;;  %v111_v19 = vld [vmem:[#allocation3 + $0x40] sm:$0xff]  ;;  %v114_v20 = vld [vmem:[#allocation3 + $0x58] sm:$0xff]  ;;  %vm85_vm3 = vcmask 392192   ;;  %vm87_vm4 = vcmask 523264  }
  0x2c   :  { %516 = vmatprep.subr.bf16.mxu0 %v515_v9  ;;  %v116_v21 = vld [vmem:[#allocation3 + $0x68] sm:$0xff]  ;;  %549 = vmatpush3.bf16.msra.mxu1 %v548_v14  ;;  %v521_v22 = vpack.c.bf16 %v112_v17, %v109_v16  ;;  %v551_v23 = vpack.c.bf16 %v114_v20, %v111_v19  ;;  %v119_v24 = vld [vmem:[#allocation3 + $0x80] sm:$0xff]  ;;  %v118_v27 = vld [vmem:[#allocation3 + $0x78] sm:$0xff]  ;;  %vm89_vm5 = vcmask 654336   ;;  %vm91_vm6 = vcmask 785408  }
  0x2d   :  { %518 = vmatpush1.bf16.msra.mxu0 %v517_v10  ;;  %v115_v25 = vld [vmem:[#allocation3 + $0x60] sm:$0xff]  ;;  %550 = vmatprep.subr.bf16.mxu1 %v688_v0  ;;  %v523_v26 = vpack.c.bf16 %v119_v24, %v116_v21  ;;  %v117_v28 = vld [vmem:[#allocation3 + $0x70] sm:$0xff]  ;;  %v120_v29 = vld [vmem:[#allocation3 + $0x88] sm:$0xff] }
  0x2e   :  { %520 = vmatprep.subr.bf16.mxu0 %v519_v18  ;;  %v122_v30 = vld [vmem:[#allocation3 + $0x98] sm:$0xff]  ;;  %v125_v31 = vld [vmem:[#allocation3 + $0xb0] sm:$0xff]  ;;  %v525_v32 = vpack.c.bf16 %v118_v27, %v115_v25  ;;  %v554_v33 = vpack.c.bf16 %v120_v29, %v117_v28  ;;  %v124_v36 = vld [vmem:[#allocation3 + $0xa8] sm:$0xff] }
  0x2f   :  { %69 = vrot.lane.b32.xlu0 %v773_v4, %s693_s4  ;;  %75 = vrot.lane.b32.xlu1 %v773_v4, %s694_s14  ;;  %v121_v34 = vld [vmem:[#allocation3 + $0x90] sm:$0xff]  ;;  %v527_v35 = vpack.c.bf16 %v125_v31, %v122_v30  ;;  %v123_v37 = vld [vmem:[#allocation3 + $0xa0] sm:$0xff]  ;;  %v126_v38 = vld [vmem:[#allocation3 + $0xb8] sm:$0xff] }
  0x30   :  { %552 = vmatpush3.bf16.msra.mxu1 %v551_v23  ;;  %v128_v39 = vld [vmem:[#allocation3 + $0xc8] sm:$0xff]  ;;  %v131_v40 = vld [vmem:[#allocation3 + $0xe0] sm:$0xff]  ;;  %v529_v41 = vpack.c.bf16 %v124_v36, %v121_v34  ;;  %v557_v42 = vpack.c.bf16 %v126_v38, %v123_v37  ;;  %v130_v45 = vld [vmem:[#allocation3 + $0xd8] sm:$0xff] }
  0x31   :  { %522 = vmatpush1.bf16.msra.mxu0 %v521_v22  ;;  %553 = vmatprep.subr.bf16.mxu1 %v688_v0  ;;  %v127_v43 = vld [vmem:[#allocation3 + $0xc0] sm:$0xff]  ;;  %v531_v44 = vpack.c.bf16 %v131_v40, %v128_v39  ;;  %v129_v46 = vld [vmem:[#allocation3 + $0xd0] sm:$0xff]  ;;  %v132_v47 = vld [vmem:[#allocation3 + $0xe8] sm:$0xff] }
  0x32   :  { %524 = vmatprep.subr.bf16.mxu0 %v523_v26  ;;  %v134_v48 = vld [vmem:[#allocation3 + $0xf8] sm:$0xff]  ;;  %v137_v49 = vld [vmem:[#allocation3 + $0x110] sm:$0xff]  ;;  %v533_v50 = vpack.c.bf16 %v130_v45, %v127_v43  ;;  %v560_v51 = vpack.c.bf16 %v132_v47, %v129_v46  ;;  %v136_v54 = vld [vmem:[#allocation3 + $0x108] sm:$0xff] }
  0x33   :  { %78 = vrot.lane.b32.xlu0 %v773_v4, %s695_s15  ;;  %v133_v52 = vld [vmem:[#allocation3 + $0xf0] sm:$0xff]  ;;  %v535_v53 = vpack.c.bf16 %v137_v49, %v134_v48  ;;  %v135_v55 = vld [vmem:[#allocation3 + $0x100] sm:$0xff]  ;;  %v138_v56 = vld [vmem:[#allocation3 + $0x118] sm:$0xff] }
  0x34   :  { %555 = vmatpush3.bf16.msra.mxu1 %v554_v33  ;;  %v140_v57 = vld [vmem:[#allocation3 + $0x128] sm:$0xff]  ;;  %v143_v58 = vld [vmem:[#allocation3 + $0x140] sm:$0xff]  ;;  %v537_v59 = vpack.c.bf16 %v136_v54, %v133_v52  ;;  %v563_v60 = vpack.c.bf16 %v138_v56, %v135_v55  ;;  %v142_v63 = vld [vmem:[#allocation3 + $0x138] sm:$0xff] }
  0x35   :  { %526 = vmatpush1.bf16.msra.mxu0 %v525_v32  ;;  %556 = vmatprep.subr.bf16.mxu1 %v688_v0  ;;  %v139_v61 = vld [vmem:[#allocation3 + $0x120] sm:$0xff]  ;;  %v539_v62 = vpack.c.bf16 %v143_v58, %v140_v57  ;;  %v141_v1 = vld [vmem:[#allocation3 + $0x130] sm:$0xff]  ;;  %v144_v2 = vld [vmem:[#allocation3 + $0x148] sm:$0xff] }
  0x36   :  { %528 = vmatprep.subr.bf16.mxu0 %v527_v35  ;;  %v146_v3 = vld [vmem:[#allocation3 + $0x158] sm:$0xff]  ;;  %v149_v5 = vld [vmem:[#allocation3 + $0x170] sm:$0xff]  ;;  %v541_v6 = vpack.c.bf16 %v142_v63, %v139_v61  ;;  %v566_v7 = vpack.c.bf16 %v144_v2, %v141_v1  ;;  %v148_v11 = vld [vmem:[#allocation3 + $0x168] sm:$0xff] }
  0x37   :  { %v145_v9 = vld [vmem:[#allocation3 + $0x150] sm:$0xff]  ;;  %v543_v10 = vpack.c.bf16 %v149_v5, %v146_v3  ;;  %v147_v12 = vld [vmem:[#allocation3 + $0x160] sm:$0xff]  ;;  %v150_v13 = vld [vmem:[#allocation3 + $0x178] sm:$0xff] }
  0x38   :  { %558 = vmatpush3.bf16.msra.mxu1 %v557_v42  ;;  %v545_v14 = vpack.c.bf16 %v148_v11, %v145_v9  ;;  %v569_v15 = vpack.c.bf16 %v150_v13, %v147_v12  ;;  %v410_v24 = vld [vmem:[%s827_s2] ss:$0 sm:$0xff]  ;;  %v295_v28 = vld [vmem:[#allocation6 + $0x8] sm:$0xff]  ;;  %v296_v32 = vld [vmem:[#allocation6 + $0x10] sm:$0xff]  ;;  %s696_s2 = smov [#allocation8]  }
  0x39   :  { %530 = vmatpush1.bf16.msra.mxu0 %v529_v41  ;;  %559 = vmatprep.subr.bf16.mxu1 %v688_v0  ;;  %v294_v27 = vld [vmem:[#allocation6] sm:$0xff]  ;;  %v297_v33 = vld [vmem:[#allocation6 + $0x18] sm:$0xff]  ;;  %v299_v36 = vld [vmem:[#allocation6 + $0x28] sm:$0xff] }
  0x3a   :  { %532 = vmatprep.subr.bf16.mxu0 %v531_v44  ;;  %v572_v31 = vpack.c.bf16 %v295_v28, %v294_v27  ;;  %v575_v34 = vpack.c.bf16 %v297_v33, %v296_v32  ;;  %v298_v35 = vld [vmem:[#allocation6 + $0x20] sm:$0xff]  ;;  %v300_v38 = vld [vmem:[#allocation6 + $0x30] sm:$0xff]  ;;  %v301_v39 = vld [vmem:[#allocation6 + $0x38] sm:$0xff] }
  0x3b   :  { %v578_v37 = vpack.c.bf16 %v299_v36, %v298_v35  ;;  %v581_v40 = vpack.c.bf16 %v301_v39, %v300_v38  ;;  %v302_v41 = vld [vmem:[#allocation6 + $0x40] sm:$0xff]  ;;  %v303_v42 = vld [vmem:[#allocation6 + $0x48] sm:$0xff]  ;;  %v305_v44 = vld [vmem:[#allocation6 + $0x58] sm:$0xff] }
  0x3c   :  { %561 = vmatpush3.bf16.msra.mxu1 %v560_v51  ;;  %v584_v43 = vpack.c.bf16 %v303_v42, %v302_v41  ;;  %v306_v46 = vld [vmem:[#allocation6 + $0x60] sm:$0xff]  ;;  %v307_v47 = vld [vmem:[#allocation6 + $0x68] sm:$0xff]  ;;  %v308_v49 = vld [vmem:[#allocation6 + $0x70] sm:$0xff] }
  0x3d   :  { %534 = vmatpush1.bf16.msra.mxu0 %v533_v50  ;;  %562 = vmatprep.subr.bf16.mxu1 %v688_v0  ;;  %v590_v48 = vpack.c.bf16 %v307_v47, %v306_v46  ;;  %v309_v50 = vld [vmem:[#allocation6 + $0x78] sm:$0xff] }
  0x3e   :  { %536 = vmatprep.subr.bf16.mxu0 %v535_v53  ;;  %v593_v51 = vpack.c.bf16 %v309_v50, %v308_v49 }
  0x40   :  { %564 = vmatpush3.bf16.msra.mxu1 %v563_v60 }
  0x41   :  { %538 = vmatpush1.bf16.msra.mxu0 %v537_v59  ;;  %565 = vmatprep.subr.bf16.mxu1 %v688_v0 }
  0x42   :  { %540 = vmatprep.subr.bf16.mxu0 %v539_v62 }
  0x44   :  { %567 = vmatpush3.bf16.msra.mxu1 %v566_v7 }
  0x45   :  { %542 = vmatpush1.bf16.msra.mxu0 %v541_v6  ;;  %568 = vmatprep.subr.bf16.mxu1 %v688_v0 }
  0x46   :  { %544 = vmatprep.subr.bf16.mxu0 %v543_v10 }
  0x48   :  { %570 = vmatpush3.bf16.msra.mxu1 %v569_v15 }
  0x49   :  { %546 = vmatpush1.bf16.msra.mxu0 %v545_v14 }
  0x4a   :  { %571 = vmatprep.subr.bf16.mxu0 %v688_v0 }
  0x9d   :  { %v67_v16 = vpop.permute.xlu0 %66  ;;  %v73_v17 = vpop.permute.xlu1 %72 }
  0x9e   :  { %v82_v18 = vsel %vm81_vm1, %v773_v4, %v67_v16 }
  0xa1   :  { %v70_v19 = vpop.permute.xlu0 %69  ;;  %v76_v20 = vpop.permute.xlu1 %75 }
  0xa2   :  { %v84_v21 = vsel %vm83_vm2, %v82_v18, %v70_v19 }
  0xa3   :  { %v86_v22 = vsel %vm85_vm3, %v84_v21, %v73_v17 }
  0xa4   :  { %v88_v23 = vsel %vm87_vm4, %v86_v22, %v76_v20 }
  0xa5   :  { %v79_v25 = vpop.permute.xlu0 %78 }
  0xa6   :  { %v90_v26 = vsel %vm89_vm5, %v88_v23, %v79_v25 }
  0xa7   :  { %v92_v29 = vsel %vm91_vm6, %v90_v26, 0.0 }
  0xa8   :  { %v100_v30 = vadd.f32 %v410_v24, %v92_v29 }
  0xaa   :  { %v101_v4 = vmax.f32 %v100_v30, 0.0 }
  0xac   :  { %102 = vst [vmem:[%s832_s7] sm:$0xff] %v101_v4  ;;  %216 = vmatmul.mubr.f32.vlgmr.msra.gmra.mrb[0].mxu0 %v101_v4  ;;  %478 = vmatmul.mubr.f32.vlgmr.msra.gmra.mrb[0].mxu1 %v101_v4  ;;  %s395_s7 = sshll.u32 %s696_s2, 4  ;;  %s396_s7 = int_to_ptr.vmem [resolvable:$true] %s395_s7 }
  0xad   :  { %573 = vmatpush3.bf16.msra.mxu0 %v572_v31  ;;  %512 = vmatprep.mubr.msk.f32.mxu0 %vm690_vm0, %v689_v8  ;;  %v304_v8 = vld [vmem:[#allocation6 + $0x50] sm:$0xff]  ;;  %s654_s20 = scalar_lea.vmem %s396_s7, 128  ;;  %p659_p3 = scmp.lt.s32.totalorder %s396_s7, %s396_s7 }
  0xae   :  { %574 = vmatprep.subr.bf16.mxu0 %v688_v0  ;;  %v587_v45 = vpack.c.bf16 %v305_v44, %v304_v8  ;;  %p655_p2 = scmp.ne.s32.totalorder %s396_s7, %s654_s20  ;;  %p660_p4 = scmp.lt.s32.totalorder %s654_s20, %s654_s20 }
  0xb0   :  { %p661_p5 = por %p660_p4, %p659_p3 }
  0xb1   :  { %576 = vmatpush3.bf16.msra.mxu0 %v575_v34 }
  0xb2   :  { %577 = vmatprep.subr.bf16.mxu0 %v688_v0  ;;  %p662_p6 = pnand %p661_p5, %p655_p2 }
  0xb5   :  { %579 = vmatpush3.bf16.msra.mxu0 %v578_v37 }
  0xb6   :  { %580 = vmatprep.subr.bf16.mxu0 %v688_v0 }
  0xb9   :  { %582 = vmatpush3.bf16.msra.mxu0 %v581_v40 }
  0xba   :  { %583 = vmatprep.subr.bf16.mxu0 %v688_v0 }
  0xbd   :  { %585 = vmatpush3.bf16.msra.mxu0 %v584_v43 }
  0xbe   :  { %586 = vmatprep.subr.bf16.mxu0 %v688_v0 }
  0xc1   :  { %588 = vmatpush3.bf16.msra.mxu0 %v587_v45 }
  0xc2   :  { %589 = vmatprep.subr.bf16.mxu0 %v688_v0 }
  0xc5   :  { %591 = vmatpush3.bf16.msra.mxu0 %v590_v48 }
  0xc6   :  { %592 = vmatprep.subr.bf16.mxu0 %v688_v0 }
  0xc9   :  { %594 = vmatpush3.bf16.msra.mxu0 %v593_v51 }
 0x17f   :  { %v217_v52 = vpop.f32.mrb[0].mxu0  ;;  %v288_v53 = vpop.f32.mrb[0].mxu1 }
 0x180   :  { %v219_v54 = vpop.f32.mrb[1].mxu0  ;;  %v479_v55 = vpop.f32.mrb[1].mxu1 }
 0x181   :  { %v292_v56 = vmin.f32 %v219_v54, %v288_v53 }
 0x183   :  { %293 = vst [vmem:[#allocation8] sm:$0xff] %v292_v56  ;;  %513 = vmatmul.mubr.f32.vlgmr.msra.gmra.mrb[2].mxu0 %v292_v56 }
 0x184   :  { %665 = shalt.err (!%p662_p6)
}
 0x185   :  { %s666_s23 = scalar_lea.hbm %s833_s8, 128 }
 0x186   :  { %p667_p7 = scmp.ne.s32.totalorder %s833_s8, %s666_s23  ;;  %p670_p8 = scmp.lt.u32.totalorder %s666_s23, %s833_s8 }
 0x188   :  { %p672_p9 = pnand %p670_p8, %p667_p7 }
 0x18a   :  { %675 = shalt.err (!%p672_p9)
}
 0x18b   :  { %398 = dma.vmem_to_hbm [thread:$0]  %s396_s7, 128, %s833_s8, [#allocation5]   ;;  %v382_v57 = vstv %s830_s5 }
 0x256   :  { %v376_v0 = vpop.f32.mrb[2].mxu0 }
 0x257   :  { %v380_v58 = vadd.f32 %v376_v0, %v217_v52  ;;  %v514_v59 = vpop.f32.mrb[3].mxu0 }
 0x259   :  { %v383_v60 = vadd.f32 %v382_v57, %v380_v58 }
 0x25b   :  { %384 = vst [vmem:[%s831_s6] sm:$0xff] %v383_v60 }
 0x25c   :  { %680 = dma.done.wait [#allocation5], 128  }
 0x25d   :  { %681 = vsyncadd [#allocation5], 4294967168 }
 0x25e   :  { %406 = vsyncpa [#allocation4], 1 }
 0x25f   :  { %407 = vsyncpa [#allocation7], 1 }
 0x260   :  { %408 = vsyncpa [#allocation5], 1 }

</bundles_post_ra>
